<compile_context>
chip_gen: v7x
topology: tpu7x:2x2x1
jax: 0.10.0
libtpu: 0.0.40
codegen_flags: <defaults>
</compile_context>

<pallas_src>
import jax
import jax.numpy as jnp
from jax.experimental import pallas as pl
from jax.experimental.pallas import tpu as pltpu


def _critic_kernel(obs_ref, act_ref, w1o_ref, w1a_ref, b1_ref,
                   w2_ref, b2_ref, w3_ref, b3_ref, out_ref):
    # obs_ref: (Bt, F) f32, act_ref: (Bt, A) f32
    # w1o_ref: (F, C*H) bf16, w1a_ref: (A, C*H) bf16, b1_ref: (1, C*H) f32
    # w2_ref:  (C, H, H) bf16, b2_ref: (1, C*H) f32
    # w3_ref:  (C, H, 1) bf16, b3_ref: (1, C) f32
    # out_ref: (Bt, C) f32
    C, H, _ = w2_ref.shape

    # Layer 1 for all critics at once (lane-stacked outputs); split-W1 avoids the
    # wrapper-side concat([features, actions]).
    obs_bf = obs_ref[...].astype(jnp.bfloat16)
    act_bf = act_ref[...].astype(jnp.bfloat16)
    h1 = (jnp.dot(obs_bf, w1o_ref[...], preferred_element_type=jnp.float32)
          + jnp.dot(act_bf, w1a_ref[...], preferred_element_type=jnp.float32)
          + b1_ref[...])
    h1 = jnp.maximum(h1, 0.0).astype(jnp.bfloat16)          # f32 ReLU, bf16 for next dot

    # Layers 2-3: static per-critic loop (no block-diagonal => no Cx wasted MXU
    # FLOPs or Cx wasted weight DMA/VMEM on the largest matrix).
    q_cols = []
    for c in range(C):
        h1_c = h1[:, c * H:(c + 1) * H]                      # static lane-block slice
        h2_c = (jnp.dot(h1_c, w2_ref[c], preferred_element_type=jnp.float32)
                + b2_ref[:, c * H:(c + 1) * H])
        h2_c = jnp.maximum(h2_c, 0.0).astype(jnp.bfloat16)
        q_cols.append(jnp.dot(h2_c, w3_ref[c], preferred_element_type=jnp.float32))  # (Bt,1)

    q = jnp.concatenate(q_cols, axis=1) + b3_ref[...]        # (Bt, C), lane-dense write
    out_ref[...] = q.astype(out_ref.dtype)


def fuse_critic_params(params, obs_dim):
    """One-time restructuring of SB3-style stacked params into the fused layout.

    params: w1 (C, D, H), b1 (C, 1, H), w2 (C, H, H), b2 (C, 1, H),
            w3 (C, H, 1), b3 (C, 1, 1), with D = obs_dim + act_dim.
    Weights are stored bf16 (MXU operand dtype); biases stay f32.
    """
    w1, b1 = params["w1"], params["b1"]
    w2, b2 = params["w2"], params["b2"]
    w3, b3 = params["w3"], params["b3"]
    C, D, H = w1.shape
    CH = C * H

    # Split W1 into obs / action parts; stack critics along the lane (output) axis.
    w1_obs = jnp.transpose(w1[:, :obs_dim, :], (1, 0, 2)).reshape(obs_dim, CH)
    w1_act = jnp.transpose(w1[:, obs_dim:, :], (1, 0, 2)).reshape(D - obs_dim, CH)

    return {
        "w1_obs": w1_obs.astype(jnp.bfloat16),
        "w1_act": w1_act.astype(jnp.bfloat16),
        "b1": b1.reshape(1, CH).astype(jnp.float32),
        "w2": w2.astype(jnp.bfloat16),                       # (C, H, H) — no block-diag
        "b2": b2.reshape(1, CH).astype(jnp.float32),
        "w3": w3.astype(jnp.bfloat16),                       # (C, H, 1)
        "b3": b3.reshape(1, C).astype(jnp.float32),          # explicit f32
        "n_critics": int(C), "hidden": int(H),
    }


def _tensorcores_per_chip():
    """2 on v7x (megacore-sharded 'parallel' grid axes), 1 on v5e/v6e."""
    try:
        kind = jax.devices()[0].device_kind.lower()
    except Exception:
        return 1
    return 2 if "v7" in kind else 1


def _pick_batch_tile(B, n_cores):
    if B <= 8:
        return B
    if n_cores > 1 and B >= 256:
        # v7x: >= 2 batch tiles so both TensorCores get work; 8-sublane aligned,
        # capped at 256 (MXU-M aligned).
        half = -(-B // 2)
        return min(256, -(-half // 8) * 8)
    if B > 512:
        return 256        # bound per-tile VMEM for very large training batches
    return B              # single-TC chips: one large tile, no per-step prologue


def _vmem_limit_bytes(b_tile, F, A, C, H):
    CH = C * H
    f32, bf16 = 4, 2
    stream = 2 * b_tile * (F + A) * f32 + 2 * b_tile * C * f32                 # act tiles (2-buf)
    weights = 2 * ((F + A) * CH * bf16 + C * H * H * bf16 + C * H * bf16
                   + 2 * CH * f32 + C * f32)                                   # resident (2-buf)
    interm = 3 * b_tile * CH * f32                                             # h1/h2/q working set
    est = stream + weights + interm
    return int(min(max(2 * est, 8 << 20), 64 << 20))                           # v7x-safe cap


def continuous_critic_forward(obs, actions, fused):
    """Forward pass of ContinuousCritic.

    obs:     (B, *obs_shape) — flattened inside (FlattenExtractor semantics)
    actions: (B, act_dim)
    fused:   output of fuse_critic_params
    Returns a (B, C) array of Q-values; out[:, c:c+1] reproduces the PyTorch tuple
    entry c, out[:, 0:1] reproduces q1_forward.
    """
    B = obs.shape[0]
    features = obs.reshape(B, -1).astype(jnp.float32)        # FlattenExtractor
    actions = actions.astype(jnp.float32)
    F = features.shape[1]
    A = actions.shape[1]
    C = fused["n_critics"]
    H = fused["hidden"]
    CH = C * H

    b_tile = _pick_batch_tile(B, _tensorcores_per_chip())
    n_tiles = -(-B // b_tile)
    B_pad = n_tiles * b_tile
    if B_pad != B:                                           # pad, don't hard-fail
        features = jnp.pad(features, ((0, B_pad - B), (0, 0)))
        actions = jnp.pad(actions, ((0, B_pad - B), (0, 0)))

    const2 = lambda b: (0, 0)                                # weights resident across tiles
    const3 = lambda b: (0, 0, 0)

    out = pl.pallas_call(
        _critic_kernel,
        out_shape=jax.ShapeDtypeStruct((B_pad, C), jnp.float32),
        grid=(n_tiles,),
        in_specs=[
            pl.BlockSpec((b_tile, F), lambda b: (b, 0)),     # obs features
            pl.BlockSpec((b_tile, A), lambda b: (b, 0)),     # actions
            pl.BlockSpec((F, CH), const2),                   # W1 obs part (bf16, lane-stacked)
            pl.BlockSpec((A, CH), const2),                   # W1 action part (bf16)
            pl.BlockSpec((1, CH), const2),                   # b1 (f32)
            pl.BlockSpec((C, H, H), const3),                 # W2 per-critic (bf16)
            pl.BlockSpec((1, CH), const2),                   # b2 (f32)
            pl.BlockSpec((C, H, 1), const3),                 # W3 per-critic (bf16)
            pl.BlockSpec((1, C), const2),                    # b3 (f32)
        ],
        out_specs=pl.BlockSpec((b_tile, C), lambda b: (b, 0)),
        compiler_params=pltpu.CompilerParams(
            dimension_semantics=("parallel",),
            vmem_limit_bytes=_vmem_limit_bytes(b_tile, F, A, C, H),
        ),
    )(features, actions,
      fused["w1_obs"], fused["w1_act"], fused["b1"],
      fused["w2"], fused["b2"], fused["w3"], fused["b3"])

    return out[:B] if B_pad != B else out


def init_params(key, obs_dim, act_dim, hidden, n_critics):
    """Deterministic synthetic params (shapes match SB3 create_mlp with net_arch=[H, H])."""
    D = obs_dim + act_dim
    keys = jax.random.split(key, 6)
    scale = 0.1
    return {
        "w1": scale * jax.random.normal(keys[0], (n_critics, D, hidden), jnp.float32),
        "b1": scale * jax.random.normal(keys[1], (n_critics, 1, hidden), jnp.float32),
        "w2": scale * jax.random.normal(keys[2], (n_critics, hidden, hidden), jnp.float32),
        "b2": scale * jax.random.normal(keys[3], (n_critics, 1, hidden), jnp.float32),
        "w3": scale * jax.random.normal(keys[4], (n_critics, hidden, 1), jnp.float32),
        "b3": scale * jax.random.normal(keys[5], (n_critics, 1, 1), jnp.float32),
    }


if __name__ == "__main__":
    key = jax.random.PRNGKey(0)
    k_obs, k_act, k_par = jax.random.split(key, 3)

    B = 2          # batch
    obs_dim = 16   # flat observation features
    act_dim = 4    # continuous action dim
    hidden = 32    # net_arch = [32, 32]
    n_critics = 2  # default TD3/SAC clipped double-Q

    obs = jax.random.normal(k_obs, (B, obs_dim), jnp.float32)
    actions = jax.random.normal(k_act, (B, act_dim), jnp.float32)
    params = init_params(k_par, obs_dim, act_dim, hidden, n_critics)

    # One-time parameter restructuring (init-time, not in the forward hot path).
    fused = fuse_critic_params(params, obs_dim)

    q_slab = continuous_critic_forward(obs, actions, fused)   # (B, C)
    q_slab = jax.block_until_ready(q_slab)
    assert q_slab.shape == (B, n_critics)

    # Sanity check against a pure-JAX f32 reference of the original per-critic math.
    # bf16 matmul operands (f32 accumulation) => loosened tolerance vs the f32 reference.
    x = jnp.concatenate([obs.reshape(B, -1), actions], axis=1)
    for c in range(n_critics):
        h1 = jnp.maximum(x @ params["w1"][c] + params["b1"][c], 0.0)
        h2 = jnp.maximum(h1 @ params["w2"][c] + params["b2"][c], 0.0)
        q_ref = h2 @ params["w3"][c] + params["b3"][c]          # (B, 1)
        q_c = q_slab[:, c:c + 1]                                 # tuple-of-(B,1) API parity
        assert q_c.shape == (B, 1)
        assert jnp.allclose(q_c, q_ref, atol=2e-2, rtol=2e-2), (c, q_c, q_ref)

    print("KERNEL_OK")
</pallas_src>

<mosaic_0001>
module attributes {stable_mosaic.version = 11 : i64} {
  func.func @_critic_kernel(%arg0: i32, %arg1: memref<2x16xf32, #tpu.memory_space<vmem>>, %arg2: memref<2x4xf32, #tpu.memory_space<vmem>>, %arg3: memref<16x64xbf16, #tpu.memory_space<vmem>>, %arg4: memref<4x64xbf16, #tpu.memory_space<vmem>>, %arg5: memref<1x64xf32, #tpu.memory_space<vmem>>, %arg6: memref<2x32x32xbf16, #tpu.memory_space<vmem>>, %arg7: memref<1x64xf32, #tpu.memory_space<vmem>>, %arg8: memref<2x32x1xbf16, #tpu.memory_space<vmem>>, %arg9: memref<1x2xf32, #tpu.memory_space<vmem>>, %arg10: memref<2x2xf32, #tpu.memory_space<vmem>>) attributes {dimension_semantics = [#tpu.dimension_semantics<parallel>], iteration_bounds = array<i64: 1>, scalar_prefetch = 0 : i64, scratch_operands = 0 : i64, tpu.core_type = #tpu.core_type<tc>, window_params = [{transform_indices = @transform_0, window_bounds = array<i64: 2, 16>}, {transform_indices = @transform_1, window_bounds = array<i64: 2, 4>}, {pipeline_mode = #tpu.pipeline_mode<synchronous>, transform_indices = @transform_2, window_bounds = array<i64: 16, 64>}, {pipeline_mode = #tpu.pipeline_mode<synchronous>, transform_indices = @transform_3, window_bounds = array<i64: 4, 64>}, {pipeline_mode = #tpu.pipeline_mode<synchronous>, transform_indices = @transform_4, window_bounds = array<i64: 1, 64>}, {pipeline_mode = #tpu.pipeline_mode<synchronous>, transform_indices = @transform_5, window_bounds = array<i64: 2, 32, 32>}, {pipeline_mode = #tpu.pipeline_mode<synchronous>, transform_indices = @transform_6, window_bounds = array<i64: 1, 64>}, {pipeline_mode = #tpu.pipeline_mode<synchronous>, transform_indices = @transform_7, window_bounds = array<i64: 2, 32, 1>}, {pipeline_mode = #tpu.pipeline_mode<synchronous>, transform_indices = @transform_8, window_bounds = array<i64: 1, 2>}, {transform_indices = @transform_9, window_bounds = array<i64: 2, 2>}]} {
    %c0 = arith.constant 0 : index
    %c0_0 = arith.constant 0 : index
    %0 = vector.load %arg1[%c0, %c0_0] : memref<2x16xf32, #tpu.memory_space<vmem>>, vector<2x16xf32>
    %1 = arith.truncf %0 : vector<2x16xf32> to vector<2x16xbf16>
    %c0_1 = arith.constant 0 : index
    %c0_2 = arith.constant 0 : index
    %2 = vector.load %arg2[%c0_1, %c0_2] : memref<2x4xf32, #tpu.memory_space<vmem>>, vector<2x4xf32>
    %3 = arith.truncf %2 : vector<2x4xf32> to vector<2x4xbf16>
    %c0_3 = arith.constant 0 : index
    %c0_4 = arith.constant 0 : index
    %4 = vector.load %arg3[%c0_3, %c0_4] : memref<16x64xbf16, #tpu.memory_space<vmem>>, vector<16x64xbf16>
    %cst = arith.constant dense<0.000000e+00> : vector<2x64xf32>
    %5 = tpu.matmul %1, %4, %cst {dimension_numbers = #tpu.dot_dimension_numbers<[1], [0], [0], [1], [0, 0, 1, 1], [], []>} : vector<2x16xbf16>, vector<16x64xbf16>, vector<2x64xf32> -> vector<2x64xf32>
    %c0_5 = arith.constant 0 : index
    %c0_6 = arith.constant 0 : index
    %6 = vector.load %arg4[%c0_5, %c0_6] : memref<4x64xbf16, #tpu.memory_space<vmem>>, vector<4x64xbf16>
    %cst_7 = arith.constant dense<0.000000e+00> : vector<2x64xf32>
    %7 = tpu.matmul %3, %6, %cst_7 {dimension_numbers = #tpu.dot_dimension_numbers<[1], [0], [0], [1], [0, 0, 1, 1], [], []>} : vector<2x4xbf16>, vector<4x64xbf16>, vector<2x64xf32> -> vector<2x64xf32>
    %8 = arith.addf %5, %7 : vector<2x64xf32>
    %c0_8 = arith.constant 0 : index
    %c0_9 = arith.constant 0 : index
    %9 = vector.load %arg5[%c0_8, %c0_9] : memref<1x64xf32, #tpu.memory_space<vmem>>, vector<1x64xf32>
    %10 = vector.broadcast %9 : vector<1x64xf32> to vector<2x64xf32>
    %11 = arith.addf %8, %10 : vector<2x64xf32>
    %cst_10 = arith.constant 0.000000e+00 : f32
    %12 = vector.broadcast %cst_10 : f32 to vector<2x64xf32>
    %13 = arith.maximumf %11, %12 : vector<2x64xf32>
    %14 = arith.truncf %13 : vector<2x64xf32> to vector<2x64xbf16>
    %15 = vector.extract_strided_slice %14 {offsets = [0, 0], sizes = [2, 32], strides = [1, 1]} : vector<2x64xbf16> to vector<2x32xbf16>
    %c0_11 = arith.constant 0 : index
    %c0_12 = arith.constant 0 : index
    %c0_13 = arith.constant 0 : index
    %16 = vector.load %arg6[%c0_11, %c0_12, %c0_13] : memref<2x32x32xbf16, #tpu.memory_space<vmem>>, vector<1x32x32xbf16>
    %17 = vector.shape_cast %16 : vector<1x32x32xbf16> to vector<32x32xbf16>
    %cst_14 = arith.constant dense<0.000000e+00> : vector<2x32xf32>
    %18 = tpu.matmul %15, %17, %cst_14 {dimension_numbers = #tpu.dot_dimension_numbers<[1], [0], [0], [1], [0, 0, 1, 1], [], []>} : vector<2x32xbf16>, vector<32x32xbf16>, vector<2x32xf32> -> vector<2x32xf32>
    %c0_15 = arith.constant 0 : index
    %c0_16 = arith.constant 0 : index
    %19 = vector.load %arg7[%c0_15, %c0_16] : memref<1x64xf32, #tpu.memory_space<vmem>>, vector<1x32xf32>
    %20 = vector.broadcast %19 : vector<1x32xf32> to vector<2x32xf32>
    %21 = arith.addf %18, %20 : vector<2x32xf32>
    %cst_17 = arith.constant 0.000000e+00 : f32
    %22 = vector.broadcast %cst_17 : f32 to vector<2x32xf32>
    %23 = arith.maximumf %21, %22 : vector<2x32xf32>
    %24 = arith.truncf %23 : vector<2x32xf32> to vector<2x32xbf16>
    %c0_18 = arith.constant 0 : index
    %c0_19 = arith.constant 0 : index
    %c0_20 = arith.constant 0 : index
    %25 = vector.load %arg8[%c0_18, %c0_19, %c0_20] : memref<2x32x1xbf16, #tpu.memory_space<vmem>>, vector<1x32x1xbf16>
    %26 = vector.shape_cast %25 : vector<1x32x1xbf16> to vector<32x1xbf16>
    %cst_21 = arith.constant dense<0.000000e+00> : vector<2x1xf32>
    %27 = tpu.matmul %24, %26, %cst_21 {dimension_numbers = #tpu.dot_dimension_numbers<[1], [0], [0], [1], [0, 0, 1, 1], [], []>} : vector<2x32xbf16>, vector<32x1xbf16>, vector<2x1xf32> -> vector<2x1xf32>
    %28 = vector.extract_strided_slice %14 {offsets = [0, 32], sizes = [2, 32], strides = [1, 1]} : vector<2x64xbf16> to vector<2x32xbf16>
    %c1 = arith.constant 1 : index
    %c0_22 = arith.constant 0 : index
    %c0_23 = arith.constant 0 : index
    %29 = vector.load %arg6[%c1, %c0_22, %c0_23] : memref<2x32x32xbf16, #tpu.memory_space<vmem>>, vector<1x32x32xbf16>
    %30 = vector.shape_cast %29 : vector<1x32x32xbf16> to vector<32x32xbf16>
    %cst_24 = arith.constant dense<0.000000e+00> : vector<2x32xf32>
    %31 = tpu.matmul %28, %30, %cst_24 {dimension_numbers = #tpu.dot_dimension_numbers<[1], [0], [0], [1], [0, 0, 1, 1], [], []>} : vector<2x32xbf16>, vector<32x32xbf16>, vector<2x32xf32> -> vector<2x32xf32>
    %c0_25 = arith.constant 0 : index
    %c32 = arith.constant 32 : index
    %32 = vector.load %arg7[%c0_25, %c32] : memref<1x64xf32, #tpu.memory_space<vmem>>, vector<1x32xf32>
    %33 = vector.broadcast %32 : vector<1x32xf32> to vector<2x32xf32>
    %34 = arith.addf %31, %33 : vector<2x32xf32>
    %cst_26 = arith.constant 0.000000e+00 : f32
    %35 = vector.broadcast %cst_26 : f32 to vector<2x32xf32>
    %36 = arith.maximumf %34, %35 : vector<2x32xf32>
    %37 = arith.truncf %36 : vector<2x32xf32> to vector<2x32xbf16>
    %c1_27 = arith.constant 1 : index
    %c0_28 = arith.constant 0 : index
    %c0_29 = arith.constant 0 : index
    %38 = vector.load %arg8[%c1_27, %c0_28, %c0_29] : memref<2x32x1xbf16, #tpu.memory_space<vmem>>, vector<1x32x1xbf16>
    %39 = vector.shape_cast %38 : vector<1x32x1xbf16> to vector<32x1xbf16>
    %cst_30 = arith.constant dense<0.000000e+00> : vector<2x1xf32>
    %40 = tpu.matmul %37, %39, %cst_30 {dimension_numbers = #tpu.dot_dimension_numbers<[1], [0], [0], [1], [0, 0, 1, 1], [], []>} : vector<2x32xbf16>, vector<32x1xbf16>, vector<2x1xf32> -> vector<2x1xf32>
    %41 = tpu.concatenate %27, %40 in 1 : vector<2x1xf32>, vector<2x1xf32> -> vector<2x2xf32>
    %c0_31 = arith.constant 0 : index
    %c0_32 = arith.constant 0 : index
    %42 = vector.load %arg9[%c0_31, %c0_32] : memref<1x2xf32, #tpu.memory_space<vmem>>, vector<1x2xf32>
    %43 = vector.broadcast %42 : vector<1x2xf32> to vector<2x2xf32>
    %44 = arith.addf %41, %43 : vector<2x2xf32>
    %c0_33 = arith.constant 0 : index
    %c0_34 = arith.constant 0 : index
    %45 = vector.load %arg10[%c0_33, %c0_34] : memref<2x2xf32, #tpu.memory_space<vmem>>, vector<2x2xf32>
    tpu.vector_store %arg10[%c0_33, %c0_34], %44 {strides = array<i32>} : memref<2x2xf32, #tpu.memory_space<vmem>>, vector<2x2xf32>,
    return
  }
  func.func @transform_0(%arg0: i32) -> (i32, i32) {
    %c0_i32 = arith.constant 0 : i32
    %c0_i32_0 = arith.constant 0 : i32
    return %arg0, %c0_i32 : i32, i32
  }
  func.func @transform_1(%arg0: i32) -> (i32, i32) {
    %c0_i32 = arith.constant 0 : i32
    %c0_i32_0 = arith.constant 0 : i32
    return %arg0, %c0_i32 : i32, i32
  }
  func.func @transform_2(%arg0: i32) -> (i32, i32) {
    %c0_i32 = arith.constant 0 : i32
    %c0_i32_0 = arith.constant 0 : i32
    %c0_i32_1 = arith.constant 0 : i32
    return %c0_i32, %c0_i32_0 : i32, i32
  }
  func.func @transform_3(%arg0: i32) -> (i32, i32) {
    %c0_i32 = arith.constant 0 : i32
    %c0_i32_0 = arith.constant 0 : i32
    %c0_i32_1 = arith.constant 0 : i32
    return %c0_i32, %c0_i32_0 : i32, i32
  }
  func.func @transform_4(%arg0: i32) -> (i32, i32) {
    %c0_i32 = arith.constant 0 : i32
    %c0_i32_0 = arith.constant 0 : i32
    %c0_i32_1 = arith.constant 0 : i32
    return %c0_i32, %c0_i32_0 : i32, i32
  }
  func.func @transform_5(%arg0: i32) -> (i32, i32, i32) {
    %c0_i32 = arith.constant 0 : i32
    %c0_i32_0 = arith.constant 0 : i32
    %c0_i32_1 = arith.constant 0 : i32
    %c0_i32_2 = arith.constant 0 : i32
    return %c0_i32, %c0_i32_0, %c0_i32_1 : i32, i32, i32
  }
  func.func @transform_6(%arg0: i32) -> (i32, i32) {
    %c0_i32 = arith.constant 0 : i32
    %c0_i32_0 = arith.constant 0 : i32
    %c0_i32_1 = arith.constant 0 : i32
    return %c0_i32, %c0_i32_0 : i32, i32
  }
  func.func @transform_7(%arg0: i32) -> (i32, i32, i32) {
    %c0_i32 = arith.constant 0 : i32
    %c0_i32_0 = arith.constant 0 : i32
    %c0_i32_1 = arith.constant 0 : i32
    %c0_i32_2 = arith.constant 0 : i32
    return %c0_i32, %c0_i32_0, %c0_i32_1 : i32, i32, i32
  }
  func.func @transform_8(%arg0: i32) -> (i32, i32) {
    %c0_i32 = arith.constant 0 : i32
    %c0_i32_0 = arith.constant 0 : i32
    %c0_i32_1 = arith.constant 0 : i32
    return %c0_i32, %c0_i32_0 : i32, i32
  }
  func.func @transform_9(%arg0: i32) -> (i32, i32) {
    %c0_i32 = arith.constant 0 : i32
    %c0_i32_0 = arith.constant 0 : i32
    return %arg0, %c0_i32 : i32, i32
  }
}

</mosaic_0001>

<bundles_post_ra>
// kernel: tpu_custom_call.1
= control target key start
LH: loop header
LB: loop body
LE: loop exit
PB: predicated region body
PF: predicated region fallthrough
CT: control target
= control target key end

     0   :  { %vm45_vm0 = vcmask 1041408   ;;  %v559_v1 = vmov 0.0   ;;  %vm560_vm1 = vmmov 0   ;;  %vm41_vm2 = vcmask 31744   ;;  %s697_s0 = inlined_call_operand.vmem [shape: f32[2,16], index: 0, kind: input, shape index: {}]   ;;  %s698_s1 = inlined_call_operand.vmem [shape: f32[2,4], index: 1, kind: input, shape index: {}]   ;;  %s699_s2 = inlined_call_operand.vmem [shape: bf16[16,64], index: 2, kind: input, shape index: {}]   ;;  %s700_s3 = inlined_call_operand.vmem [shape: bf16[4,64], index: 3, kind: input, shape index: {}]   ;;  %s701_s4 = inlined_call_operand.vmem [shape: f32[1,64], index: 4, kind: input, shape index: {}]   ;;  %s702_s5 = inlined_call_operand.vmem [shape: bf16[2,32,32], index: 5, kind: input, shape index: {}]   ;;  %s703_s6 = inlined_call_operand.vmem [shape: f32[1,64], index: 6, kind: input, shape index: {}]   ;;  %s704_s7 = inlined_call_operand.vmem [shape: bf16[2,32,1], index: 7, kind: input, shape index: {}]   ;;  %s705_s8 = inlined_call_operand.vmem [shape: f32[1,2], index: 8, kind: input, shape index: {}]   ;;  %s706_s9 = inlined_call_operand.hbm [shape: f32[2,2], index: 9, kind: output, shape index: {}]  }
   0x1   :  { %v40_v0 = vld [vmem:[%s700_s3] sm:$0x3]  ;;  %477 = vmatprep.subr.bf16.mxu0 %v559_v1  ;;  %483 = vmatprep.subr.bf16.mxu1 %v559_v1  ;;  %vm95_vm3 = vcmask 130048  }
   0x2   :  { %v47_v2 = vsel %vm45_vm0, %v40_v0, 0  ;;  %v526_v3 = vld [vmem:[%s699_s2] sm:$0xff]   ;;  %479 = vmatprep.mubr.msk.bf16.mxu0 %vm560_vm1, %v559_v1  ;;  %485 = vmatprep.mubr.msk.bf16.mxu1 %vm560_vm1, %v559_v1 }
   0x3   :  { %478 = vmatpush3.bf16.msra.mxu0 %v47_v2  ;;  %v36_v4 = vld [vmem:[%s698_s1] sm:$0x3]  ;;  %484 = vmatpush3.bf16.msra.mxu1 %v526_v3 }
   0x4   :  { %v34_v5 = vld [vmem:[%s697_s0] sm:$0x3]  ;;  %v37_v6 = vpack.c.bf16 %v36_v4, %v36_v4  ;;  %489 = vmatprep.subr.bf16.mxu0 %v559_v1  ;;  %497 = vmatprep.subr.bf16.mxu1 %v559_v1 }
   0x5   :  { %v35_v7 = vpack.c.bf16 %v34_v5, %v34_v5 }
   0x6   :  { %480 = vmatmul.mubr.msk.bf16.vlgmr.msra.gmra.mrb[0].mxu0 %vm41_vm2, %v37_v6 }
   0x7   :  { %486 = vmatmul.mubr.msk.bf16.vlgmr.msra.gmra.mrb[0].mxu1 %vm95_vm3, %v35_v7  ;;  %493 = vmatprep.mubr.msk.bf16.mxu0 %vm560_vm1, %v559_v1 }
   0x8   :  { %501 = vmatprep.mubr.msk.bf16.mxu1 %vm560_vm1, %v559_v1 }
   0x9   :  { %14 = vsyncpa [#allocation3], 0  ;;  %v527_v8 = vld [vmem:[%s702_s5] sm:$0xff]   ;;  %v528_v9 = vld [vmem:[%s702_s5 + $0x8] sm:$0xff]   ;;  %vm172_vm4 = vcmask 261120   ;;  %s561_s21 = smov 96  }
   0xa   :  { %490 = vmatpush3.bf16.msra.mxu0 %v527_v8  ;;  %v438_v13 = vld [vmem:[%s701_s4] ss:$0 sm:$0xff]  ;;  %v529_v22 = vld [vmem:[%s702_s5 + $0x10] sm:$0xff]   ;;  %v530_v24 = vld [vmem:[%s702_s5 + $0x18] sm:$0xff]   ;;  %vm409_vm5 = vcmask 7168   ;;  %s563_s12 = smov [#allocation2]  }
   0xb   :  { %491 = vmatprep.subr.bf16.mxu0 %v559_v1  ;;  %v439_v25 = vld [vmem:[%s703_s6] ss:$0 sm:$0xff]  ;;  %v532_v27 = vld [vmem:[%s704_s7 + $0x8] sm:$0xff]   ;;  %v533_v35 = vld [vmem:[%s704_s7 + $0x10] sm:$0xff]   ;;  %s427_s13 = sshll.u32 %s563_s12, 4  ;;  %vm419_vm6 = vcmask 9216   ;;  %s428_s13 = int_to_ptr.vmem [resolvable:$true] %s427_s13 }
   0xc   :  { %v531_v26 = vld [vmem:[%s704_s7] sm:$0xff]   ;;  %v534_v37 = vld [vmem:[%s704_s7 + $0x18] sm:$0xff]   ;;  %s562_s7 = smov 1   ;;  %s535_s14 = scalar_lea.vmem %s428_s13, 32 }
   0xd   :  { %498 = vmatpush3.bf16.msra.mxu1 %v531_v26  ;;  %v460_v54 = vld [vmem:[%s705_s8] ss:$0 sm:$0xff]  ;;  %p536_p0 = scmp.ne.s32.totalorder %s428_s13, %s535_s14  ;;  %p540_p1 = scmp.lt.s32.totalorder %s428_s13, %s428_s13 }
   0xe   :  { %492 = vmatpush3.bf16.msra.mxu0 %v528_v9  ;;  %499 = vmatprep.subr.bf16.mxu1 %v559_v1  ;;  %p541_p2 = scmp.lt.s32.totalorder %s535_s14, %s535_s14 }
   0xf   :  { %505 = vmatprep.subr.bf16.mxu0 %v559_v1 }
  0x10   :  { %p542_p3 = por %p541_p2, %p540_p1 }
  0x11   :  { %500 = vmatpush3.bf16.msra.mxu1 %v532_v27 }
  0x12   :  { %513 = vmatprep.subr.bf16.mxu1 %v559_v1  ;;  %p543_p4 = pnand %p542_p3, %p536_p0 }
  0xd9   :  { %v83_v10 = vpop.f32.mrb[0].mxu0 }
  0xda   :  { %v481_v11 = vpop.f32.mrb[1].mxu0  ;;  %v133_v12 = vpop.f32.mrb[0].mxu1 }
  0xdb   :  { %v134_v14 = vadd.f32 %v133_v12, %v83_v10  ;;  %v86_v15 = vpop.f32.mrb[2].mxu0  ;;  %v487_v16 = vpop.f32.mrb[1].mxu1 }
  0xdc   :  { %v482_v17 = vpop.f32.mrb[3].mxu0  ;;  %v136_v18 = vpop.f32.mrb[2].mxu1 }
  0xdd   :  { %v488_v19 = vpop.f32.mrb[3].mxu1  ;;  %v146_v20 = vadd.f32 %v438_v13, %v134_v14 }
  0xdf   :  { %v147_v21 = vmax.f32 %v146_v20, 0.0 }
  0xe1   :  { %v148_v23 = vpack.c.bf16 %v147_v21, %v147_v21 }
  0xe3   :  { %283 = vrot.lane.b32.xlu0 %v148_v23, %s561_s21  ;;  %494 = vmatmul.mubr.msk.bf16.vlgmr.msra.gmra.mrb[4].mxu0 %vm172_vm4, %v148_v23 }
  0xe4   :  { %506 = vmatpush3.bf16.msra.mxu0 %v529_v22  ;;  %509 = vmatprep.mubr.msk.bf16.mxu0 %vm560_vm1, %v559_v1 }
  0xe5   :  { %507 = vmatprep.subr.bf16.mxu0 %v559_v1 }
  0xe7   :  { %297 = vrot.lane.b32.xlu0 %v439_v25, %s561_s21 }
  0xe8   :  { %508 = vmatpush3.bf16.msra.mxu0 %v530_v24 }
 0x155   :  { %v284_v28 = vpop.permute.xlu0 %283 }
 0x156   :  { %510 = vmatmul.mubr.msk.bf16.vlgmr.msra.gmra.mrb[8].mxu0 %vm172_vm4, %v284_v28 }
 0x159   :  { %v298_v38 = vpop.permute.xlu0 %297 }
 0x1b6   :  { %v210_v29 = vpop.f32.mrb[4].mxu0 }
 0x1b7   :  { %v211_v30 = vadd.f32 %v439_v25, %v210_v29  ;;  %v495_v31 = vpop.f32.mrb[5].mxu0 }
 0x1b8   :  { %v213_v32 = vpop.f32.mrb[6].mxu0 }
 0x1b9   :  { %v216_v33 = vmax.f32 %v211_v30, 0.0  ;;  %v496_v34 = vpop.f32.mrb[7].mxu0 }
 0x1bb   :  { %v217_v36 = vpack.c.bf16 %v216_v33, %v216_v33 }
 0x1bd   :  { %502 = vmatmul.mubr.msk.bf16.vlgmr.msra.gmra.mrb[4].mxu1 %vm172_vm4, %v217_v36 }
 0x1be   :  { %514 = vmatpush3.bf16.msra.mxu1 %v533_v35  ;;  %517 = vmatprep.mubr.msk.bf16.mxu1 %vm560_vm1, %v559_v1 }
 0x1bf   :  { %515 = vmatprep.subr.bf16.mxu1 %v559_v1 }
 0x1c2   :  { %516 = vmatpush3.bf16.msra.mxu1 %v534_v37 }
 0x229   :  { %v337_v39 = vpop.f32.mrb[8].mxu0 }
 0x22a   :  { %v338_v40 = vadd.f32 %v337_v39, %v298_v38  ;;  %v511_v41 = vpop.f32.mrb[9].mxu0 }
 0x22b   :  { %v340_v42 = vpop.f32.mrb[10].mxu0 }
 0x22c   :  { %v343_v43 = vmax.f32 %v338_v40, 0.0  ;;  %v512_v44 = vpop.f32.mrb[11].mxu0 }
 0x22e   :  { %v344_v45 = vpack.c.bf16 %v343_v43, %v343_v43 }
 0x230   :  { %518 = vmatmul.mubr.msk.bf16.vlgmr.msra.gmra.mrb[8].mxu1 %vm172_vm4, %v344_v45 }
 0x290   :  { %v271_v46 = vpop.f32.mrb[4].mxu1 }
 0x291   :  { %v503_v47 = vpop.f32.mrb[5].mxu1 }
 0x292   :  { %v274_v48 = vpop.f32.mrb[6].mxu1 }
 0x293   :  { %v504_v49 = vpop.f32.mrb[7].mxu1 }
 0x303   :  { %v399_v50 = vpop.f32.mrb[8].mxu1 }
 0x304   :  { %406 = vrot.lane.b32.xlu1 %v399_v50, %s562_s7  ;;  %v519_v51 = vpop.f32.mrb[9].mxu1 }
 0x305   :  { %v402_v52 = vpop.f32.mrb[10].mxu1 }
 0x306   :  { %v520_v53 = vpop.f32.mrb[11].mxu1 }
 0x376   :  { %v407_v55 = vpop.permute.xlu1 %406 }
 0x377   :  { %v410_v56 = vsel %vm409_vm5, %v271_v46, %v407_v55 }
 0x378   :  { %v418_v57 = vadd.f32 %v460_v54, %v410_v56 }
 0x37a   :  { %420 = vst.msk [vmem:[#allocation2] sm:$0x3] %vm419_vm6, %v418_v57 }
 0x37b   :  { %546 = shalt.err (!%p543_p4)
}
 0x37c   :  { %s547_s0 = scalar_lea.hbm %s706_s9, 32 }
 0x37d   :  { %p548_p5 = scmp.ne.s32.totalorder %s706_s9, %s547_s0  ;;  %p551_p6 = scmp.lt.u32.totalorder %s547_s0, %s706_s9 }
 0x37f   :  { %p553_p7 = pnand %p551_p6, %p548_p5 }
 0x381   :  { %556 = shalt.err (!%p553_p7)
}
 0x382   :  { %430 = dma.vmem_to_hbm [thread:$0]  %s428_s13, 32, %s706_s9, [#allocation3]  }
 0x383   :  { %557 = dma.done.wait [#allocation3], 32  }
 0x384   :  { %558 = vsyncadd [#allocation3], 4294967264 }
 0x385   :  { %434 = vsyncpa [#allocation3], 1 }

</bundles_post_ra>
